<compile_context>
chip_gen: v7x
topology: tpu7x:2x2x1
jax: 0.10.0
libtpu: 0.0.40
codegen_flags: <defaults>
</compile_context>

<pallas_src>
import math

import jax
import jax.numpy as jnp
from jax.experimental import pallas as pl
from jax.experimental.pallas import tpu as pltpu


def _soft_exp_math(x_f32, alpha: float, beta: float):
    """Trace-time-folded SoftExponential on an f32 array (alpha/beta are Python floats)."""
    if alpha == 0.0:
        return x_f32 * beta
    # alpha < 0: -beta/alpha == beta/|alpha|, exp arg -alpha*x == |alpha|*x
    # alpha > 0:  beta/alpha == beta/|alpha|, exp arg  alpha*x == |alpha|*x
    coef = beta / abs(alpha)
    scale = abs(alpha)
    return coef * (jnp.exp(scale * x_f32) - 1.0)


def _make_soft_exponential_kernel(alpha: float, beta: float):
    alpha = float(alpha)
    beta = float(beta)

    def kernel(x_ref, o_ref):
        # HBM-bound kernel: the f32 cast (VPU) and exp (EUP) are free filler.
        x = x_ref[...].astype(jnp.float32)
        o_ref[...] = _soft_exp_math(x, alpha, beta).astype(o_ref.dtype)

    return kernel


def _choose_lane(n: int):
    """Widest lane dim (multiple of 128) dividing n, preferring >= 8 rows."""
    best = None
    for cand in (1024, 512, 256, 128):
        if n % cand == 0:
            if best is None:
                best = cand
            if n // cand >= 8:
                return cand
    return best


def _ceil_to(v: int, m: int) -> int:
    return -(-v // m) * m


def _tile_budget():
    """Per-generation tile size and explicit VMEM limit.

    in + out, double-buffered = 4 live tiles. Keep them well under physical
    VMEM (64 MiB/TC on v7x, 128 MiB on v5e/v6e); set the scoped limit
    explicitly so v5e's 16 MiB default doesn't reject the config.
    """
    try:
        vmem_cap = int(pltpu.get_tpu_info().vmem_capacity_bytes)
    except Exception:
        vmem_cap = 64 << 20  # conservative fallback (v7x per-TensorCore)
    tile_bytes = min(8 << 20, vmem_cap // 8)          # 8 MiB on v5e/v6e/v7x
    vmem_limit = min(vmem_cap, 4 * tile_bytes + (8 << 20))
    return tile_bytes, vmem_limit


def _run_kernel_2d(x2, alpha: float, beta: float):
    """Run the elementwise kernel over a lane-aligned 2D view."""
    rows, lane = x2.shape
    dtype = x2.dtype
    dsize = jnp.dtype(dtype).itemsize
    # Sublane packing multiple: 8 for 32-bit, 16 for bf16, 32 for 8-bit dtypes.
    pack = max(1, 4 // dsize) * 8

    tile_bytes, vmem_limit = _tile_budget()
    tile_rows = max(pack, (tile_bytes // (lane * dsize)) // pack * pack)
    tile_rows = min(tile_rows, rows)

    # Megacore (v7x): guarantee >= 2 grid steps (even count) when there is
    # enough work so the "parallel" axis shards across both TensorCores.
    if rows >= 2 * pack:
        n_steps = max(2, pl.cdiv(rows, tile_rows))
        if n_steps % 2:
            n_steps += 1
        tile_rows = max(pack, _ceil_to(pl.cdiv(rows, n_steps), pack))

    grid = (pl.cdiv(rows, tile_rows),)

    n_elems = rows * lane
    if float(alpha) == 0.0:
        flops, transc = n_elems, 0
    else:
        flops, transc = 3 * n_elems, n_elems

    return pl.pallas_call(
        _make_soft_exponential_kernel(alpha, beta),
        out_shape=jax.ShapeDtypeStruct((rows, lane), dtype),
        grid=grid,
        in_specs=[pl.BlockSpec((tile_rows, lane), lambda i: (i, 0))],
        out_specs=pl.BlockSpec((tile_rows, lane), lambda i: (i, 0)),
        compiler_params=pltpu.CompilerParams(
            dimension_semantics=("parallel",),
            vmem_limit_bytes=vmem_limit,
        ),
        cost_estimate=pl.CostEstimate(
            flops=flops,
            transcendentals=transc,
            bytes_accessed=2 * n_elems * dsize,
        ),
    )(x2)


def soft_exponential(x, alpha=-0.5, beta=1000.0):
    """Apply SoftExponential elementwise via a Pallas TPU kernel."""
    # TODO(synk): if alpha/beta ever become traced (learnable) values instead of
    # Python floats, move them to an SMEM params ref and branch with lax.cond.
    alpha = float(alpha)
    beta = float(beta)
    orig_shape = x.shape
    orig_dtype = x.dtype
    n = math.prod(orig_shape)
    if n == 0:
        return x

    lane = _choose_lane(n)
    if lane is not None:
        # Common case: contiguous reshape to a lane-dense 2D slab, no extra HBM pass.
        out2 = _run_kernel_2d(x.reshape(-1, lane), alpha, beta)
        return out2.reshape(orig_shape)

    # Rare fallback: element count not a multiple of 128. Run the kernel on the
    # 128-aligned prefix and compute the <128-element tail with plain jnp
    # (no full-array pad/concat before the kernel).
    flat = x.reshape(-1)
    n_main = (n // 128) * 128
    parts = []
    if n_main > 0:
        main_lane = _choose_lane(n_main) or 128
        main_out = _run_kernel_2d(flat[:n_main].reshape(-1, main_lane), alpha, beta)
        parts.append(main_out.reshape(-1))
    if n_main < n:
        tail = flat[n_main:].astype(jnp.float32)
        parts.append(_soft_exp_math(tail, alpha, beta).astype(orig_dtype))
    out_flat = parts[0] if len(parts) == 1 else jnp.concatenate(parts)
    return out_flat.reshape(orig_shape)


def _reference(x, alpha=-0.5, beta=1000.0):
    x = x.astype(jnp.float32)
    if alpha < 0:
        return -1.0 * beta / alpha * (jnp.exp(-alpha * x) - 1.0)
    elif alpha == 0:
        return x * beta
    else:
        return 1.0 * beta / alpha * (jnp.exp(alpha * x) - 1.0)


if __name__ == "__main__":
    key = jax.random.PRNGKey(0)
    # NCHW-style input, small shapes
    x = jax.random.normal(key, (2, 4, 16, 16), dtype=jnp.float32)

    # Deterministic parameter values mirroring nn.Parameter(torch.tensor(...))
    alpha = -0.5
    beta = 1000.0

    y = jax.block_until_ready(soft_exponential(x, alpha, beta))

    y_ref = _reference(x, alpha, beta)
    assert y.shape == x.shape
    assert y.dtype == x.dtype
    assert jnp.allclose(y, y_ref, rtol=1e-5, atol=1e-3), (
        float(jnp.max(jnp.abs(y - y_ref)))
    )

    print("KERNEL_OK")
</pallas_src>

<mosaic_0001>
module attributes {stable_mosaic.version = 11 : i64} {
  func.func @kernel(%arg0: i32, %arg1: memref<8x256xf32, #tpu.memory_space<vmem>>, %arg2: memref<8x256xf32, #tpu.memory_space<vmem>>) attributes {dimension_semantics = [#tpu.dimension_semantics<parallel>], iteration_bounds = array<i64: 1>, scalar_prefetch = 0 : i64, scratch_operands = 0 : i64, tpu.core_type = #tpu.core_type<tc>, window_params = [{transform_indices = @transform_0, window_bounds = array<i64: 8, 256>}, {transform_indices = @transform_1, window_bounds = array<i64: 8, 256>}]} {
    %c0 = arith.constant 0 : index
    %c0_0 = arith.constant 0 : index
    %0 = vector.load %arg1[%c0, %c0_0] : memref<8x256xf32, #tpu.memory_space<vmem>>, vector<8x256xf32>
    %cst = arith.constant 5.000000e-01 : f32
    %1 = vector.broadcast %cst : f32 to vector<8x256xf32>
    %2 = arith.mulf %1, %0 : vector<8x256xf32>
    %3 = math.exp %2 : vector<8x256xf32>
    %cst_1 = arith.constant 1.000000e+00 : f32
    %4 = vector.broadcast %cst_1 : f32 to vector<8x256xf32>
    %5 = arith.subf %3, %4 : vector<8x256xf32>
    %cst_2 = arith.constant 2.000000e+03 : f32
    %6 = vector.broadcast %cst_2 : f32 to vector<8x256xf32>
    %7 = arith.mulf %6, %5 : vector<8x256xf32>
    %c0_3 = arith.constant 0 : index
    %c0_4 = arith.constant 0 : index
    %8 = vector.load %arg2[%c0_3, %c0_4] : memref<8x256xf32, #tpu.memory_space<vmem>>, vector<8x256xf32>
    tpu.vector_store %arg2[%c0_3, %c0_4], %7 {strides = array<i32>} : memref<8x256xf32, #tpu.memory_space<vmem>>, vector<8x256xf32>,
    return
  }
  func.func @transform_0(%arg0: i32) -> (i32, i32) {
    %c0_i32 = arith.constant 0 : i32
    %c0_i32_0 = arith.constant 0 : i32
    return %arg0, %c0_i32 : i32, i32
  }
  func.func @transform_1(%arg0: i32) -> (i32, i32) {
    %c0_i32 = arith.constant 0 : i32
    %c0_i32_0 = arith.constant 0 : i32
    return %arg0, %c0_i32 : i32, i32
  }
}

</mosaic_0001>

<bundles_post_ra>
// kernel: tpu_custom_call.1
= control target key start
LH: loop header
LB: loop body
LE: loop exit
PB: predicated region body
PF: predicated region fallthrough
CT: control target
= control target key end

     0   :  { %6 = vsyncpa [#allocation3], 0  ;;  %s142_s0 = inlined_call_operand.hbm [shape: f32[8,256], index: 0, kind: input, shape index: {}]   ;;  %s143_s1 = inlined_call_operand.hbm [shape: f32[8,256], index: 1, kind: output, shape index: {}]  }
   0x1   :  { %7 = vsyncpa [#allocation4], 0  ;;  %s106_s6 = smov [#allocation2]   ;;  %s58_s10 = scalar_lea.hbm %s142_s0, 256 }
   0x2   :  { %s14_s7 = sshll.u32 %s106_s6, 4  ;;  %p59_p0 = scmp.ne.s32.totalorder %s142_s0, %s58_s10  ;;  %s15_s7 = int_to_ptr.vmem [resolvable:$true] %s14_s7 }
   0x3   :  { %p62_p1 = scmp.lt.u32.totalorder %s58_s10, %s142_s0 }
   0x5   :  { %p64_p2 = pnand %p62_p1, %p59_p0 }
   0x7   :  { %67 = shalt.err (!%p64_p2)
}
   0x8   :  { %s68_s15 = scalar_lea.vmem %s15_s7, 256  ;;  %p73_p4 = scmp.lt.s32.totalorder %s15_s7, %s15_s7 }
   0x9   :  { %p69_p3 = scmp.ne.s32.totalorder %s15_s7, %s68_s15  ;;  %p74_p5 = scmp.lt.s32.totalorder %s68_s15, %s68_s15 }
   0xb   :  { %p75_p6 = por %p74_p5, %p73_p4 }
   0xd   :  { %p76_p7 = pnand %p75_p6, %p69_p3 }
   0xf   :  { %79 = shalt.err (!%p76_p7)
}
  0x10   :  { %17 = dma.hbm_to_vmem [thread:$0]  %s142_s0, 256, %s15_s7, [#allocation3]  }
  0x11   :  { %102 = dma.done.wait [#allocation3], 256  }
  0x12   :  { %103 = vsyncadd [#allocation3], 4294967040  ;;  %v21_v0 = vld [vmem:[#allocation2] sm:$0xff]  ;;  %v22_v1 = vld [vmem:[#allocation2 + $0x8] sm:$0xff]  ;;  %s107_s18 = smov [#allocation5]  }
  0x13   :  { %v23_v2 = vmul.f32 0.5, %v21_v0  ;;  %v24_v3 = vmul.f32 0.5, %v22_v1  ;;  %s41_s19 = sshll.u32 %s107_s18, 4  ;;  %s42_s19 = int_to_ptr.vmem [resolvable:$true] %s41_s19 }
  0x14   :  { %s80_s0 = scalar_lea.vmem %s42_s19, 256  ;;  %p85_p9 = scmp.lt.s32.totalorder %s42_s19, %s42_s19 }
  0x15   :  { %v25_v4 = vmul.f32 1.442695, %v23_v2  ;;  %v27_v5 = vmul.f32 1.442695, %v24_v3  ;;  %p81_p8 = scmp.ne.s32.totalorder %s42_s19, %s80_s0  ;;  %p86_p10 = scmp.lt.s32.totalorder %s80_s0, %s80_s0 }
  0x17   :  { %54 = vpow2.f32 %v25_v4  ;;  %p87_p11 = por %p86_p10, %p85_p9 }
  0x18   :  { %56 = vpow2.f32 %v27_v5 }
  0x19   :  { %p88_p12 = pnand %p87_p11, %p81_p8 }
  0x21   :  { %v55_v6 = vpop.eup %54 }
  0x22   :  { %v57_v7 = vpop.eup %56  ;;  %v50_v8 = vadd.f32 -1.0, %v55_v6 }
  0x23   :  { %v51_v9 = vadd.f32 -1.0, %v57_v7 }
  0x24   :  { %v31_v10 = vmul.f32 2000.0, %v50_v8 }
  0x25   :  { %v32_v11 = vmul.f32 2000.0, %v51_v9 }
  0x26   :  { %33 = vst [vmem:[#allocation5] sm:$0xff] %v31_v10 }
  0x27   :  { %34 = vst [vmem:[#allocation5 + $0x8] sm:$0xff] %v32_v11 }
  0x28   :  { %91 = shalt.err (!%p88_p12)
}
  0x29   :  { %s92_s22 = scalar_lea.hbm %s143_s1, 256 }
  0x2a   :  { %p93_p13 = scmp.ne.s32.totalorder %s143_s1, %s92_s22  ;;  %p96_p0 = scmp.lt.u32.totalorder %s92_s22, %s143_s1 }
  0x2c   :  { %p98_p1 = pnand %p96_p0, %p93_p13 }
  0x2e   :  { %101 = shalt.err (!%p98_p1)
}
  0x2f   :  { %44 = dma.vmem_to_hbm [thread:$0]  %s42_s19, 256, %s143_s1, [#allocation4]  }
  0x30   :  { %104 = dma.done.wait [#allocation4], 256  }
  0x31   :  { %105 = vsyncadd [#allocation4], 4294967040 }
  0x32   :  { %48 = vsyncpa [#allocation3], 1 }
  0x33   :  { %49 = vsyncpa [#allocation4], 1 }

</bundles_post_ra>
